<compile_context>
chip_gen: v7x
topology: tpu7x:2x2x1
jax: 0.10.0
libtpu: 0.0.40
codegen_flags: <defaults>
</compile_context>

<pallas_src>
import functools

import jax
import jax.numpy as jnp
from jax import lax
from jax.experimental import pallas as pl
from jax.experimental.pallas import tpu as pltpu


def _round_up(n, m):
    return ((n + m - 1) // m) * m


def _fused_mlp_kernel(x_ref, *refs, num_layers):
    """Runs the full MLP on one batch tile, feature-major.

    x_ref : [in0, TB]        input tile, batch on the 128-lane axis
    refs  = (w0, b0, w1, b1, ..., w_{L-1}, b_{L-1}, o_ref)
      w_i : [out_i, in_i]    (PyTorch layout; storage dtype = MXU feed dtype)
      b_i : [out_i, 1]       fp32
      o   : [out_last, TB]

    NOTE: when batch % TB != 0 the padded lanes of the last tile hold
    undefined data.  This is safe because every op here is column-
    (per-example-) independent and those lanes are masked on writeback; any
    future cross-column op (reductions, normalization) must mask them first.
    """
    o_ref = refs[-1]
    feed_dtype = refs[0].dtype
    # Cast the input tile once to the MXU feed dtype; hidden activations are
    # then carried in that dtype (cast fused into the epilogue below).
    h = x_ref[...].astype(feed_dtype)                     # [in0, TB]
    for i in range(num_layers):
        w = refs[2 * i][...]                              # [out_i, in_i]
        b = refs[2 * i + 1][...]                          # [out_i, 1] fp32
        # y_T = W @ h_T on the MXU: contract over in_i; the batch tile fills
        # the MXU N dimension (lane axis). fp32 accumulation.
        y = lax.dot_general(
            w, h,
            dimension_numbers=(((1,), (0,)), ((), ())),
            preferred_element_type=jnp.float32,
        )                                                 # [out_i, TB] fp32
        y = y + b                                         # bias (VPU, fp32)
        if i < num_layers - 1:
            # ReLU + cast back to the feed dtype fused in one epilogue pass.
            h = jnp.maximum(y, 0.0).astype(feed_dtype)
        else:
            h = y                                         # no act after last
    o_ref[...] = h.astype(o_ref.dtype)


def prepare_params(params, mxu_dtype=jnp.bfloat16):
    """One-time param prep (NOT per call): cast W to the MXU feed dtype
    (bf16 is the right choice on v5e, v6e and v7x -- the MXU is natively bf16
    and the fp32 epilogue is unaffected) and reshape biases to [out, 1] fp32
    for the feature-major epilogue."""
    prepped = []
    for w, b in params:
        prepped.append((w.astype(mxu_dtype),
                        b.reshape(-1, 1).astype(jnp.float32)))
    return prepped


def _choose_batch_tile(batch, batch_tile):
    """Batch tile on the lane axis: either the whole batch in one full-extent
    block, or a multiple of 128 (lane constraint), clamped so v7x's two
    TensorCores each get at least one grid step when possible."""
    if batch <= 128:
        return batch                                      # single full block
    tb = min(_round_up(batch_tile, 128), _round_up(batch, 128))
    if pl.cdiv(batch, tb) < 2:
        # Guarantee >= 2 grid steps so dimension_semantics=("parallel",) can
        # actually shard the batch axis across both v7x TensorCores.
        tb = max(128, _round_up(pl.cdiv(batch, 2), 128))
    return tb


def mlp_forward(x, prepped_params, *, batch_tile=512):
    """x: [B, in0]; prepped_params: output of prepare_params. Returns [B, out_last].

    Internally feature-major.  In production, feed x already transposed (and
    already bf16) from the producer and consume the [out_last, B] output
    directly to avoid the wrapper-side transposes.
    """
    batch, in0 = x.shape
    num_layers = len(prepped_params)
    out_last = prepped_params[-1][0].shape[0]

    tb = _choose_batch_tile(batch, batch_tile)
    nb = pl.cdiv(batch, tb)

    x_t = x.T                                             # [in0, B]

    flat_inputs = [x_t]
    in_specs = [pl.BlockSpec((in0, tb), lambda i: (0, i))]
    for (w, b) in prepped_params:
        out_d, in_d = w.shape
        flat_inputs.append(w)
        in_specs.append(pl.BlockSpec((out_d, in_d), lambda i: (0, 0)))
        flat_inputs.append(b)
        in_specs.append(pl.BlockSpec((out_d, 1), lambda i: (0, 0)))

    kernel = functools.partial(_fused_mlp_kernel, num_layers=num_layers)

    out_t = pl.pallas_call(
        kernel,
        out_shape=jax.ShapeDtypeStruct((out_last, batch), x.dtype),
        grid_spec=pl.GridSpec(
            grid=(nb,),
            in_specs=in_specs,
            out_specs=pl.BlockSpec((out_last, tb), lambda i: (0, i)),
        ),
        compiler_params=pltpu.CompilerParams(
            # Batch tiles are independent -> shard across TCs on v7x.
            dimension_semantics=("parallel",),
        ),
    )(*flat_inputs)
    return out_t.T


def init_mlp_params(key, dims, dtype=jnp.float32):
    """Deterministic params, PyTorch nn.Linear shapes: W [out,in], b [out]."""
    params = []
    for i in range(len(dims) - 1):
        in_dim, out_dim = dims[i], dims[i + 1]
        key, kw, kb = jax.random.split(key, 3)
        bound = 1.0 / jnp.sqrt(in_dim)
        w = jax.random.uniform(kw, (out_dim, in_dim), dtype, -bound, bound)
        b = jax.random.uniform(kb, (out_dim,), dtype, -bound, bound)
        params.append((w, b))
    return params


def mlp_reference(x, params):
    n = len(params)
    for i, (w, b) in enumerate(params):
        x = x @ w.T + b
        if i < n - 1:
            x = jnp.maximum(x, 0.0)
    return x


if __name__ == "__main__":
    key = jax.random.PRNGKey(0)
    k_in, k_param, k_in2 = jax.random.split(key, 3)

    dims = [32, 64, 48, 16]   # MLP(dims=[32, 64, 48, 16]) with default ReLU act
    params = init_mlp_params(k_param, dims)
    params_bf16 = prepare_params(params, mxu_dtype=jnp.bfloat16)   # fast path (all gens)
    params_f32 = prepare_params(params, mxu_dtype=jnp.float32)     # tight-tolerance check

    # --- small batch: single full-extent block -----------------------------
    batch = 8
    x = jax.random.normal(k_in, (batch, dims[0]), dtype=jnp.float32)
    ref = jax.block_until_ready(mlp_reference(x, params))

    out_f32 = jax.block_until_ready(mlp_forward(x, params_f32))
    assert out_f32.shape == (batch, dims[-1])
    assert jnp.allclose(out_f32, ref, atol=1e-4, rtol=1e-4)

    out_bf16 = jax.block_until_ready(mlp_forward(x, params_bf16))
    assert out_bf16.shape == (batch, dims[-1])
    assert jnp.allclose(out_bf16, ref, atol=5e-2, rtol=5e-2)

    # --- larger batch: exercises 128-lane tiling, a partial (masked) last
    # tile, and the >=2-grid-step clamp for v7x megacore sharding -----------
    batch2 = 384
    x2 = jax.random.normal(k_in2, (batch2, dims[0]), dtype=jnp.float32)
    ref2 = jax.block_until_ready(mlp_reference(x2, params))
    out2 = jax.block_until_ready(mlp_forward(x2, params_bf16))
    assert out2.shape == (batch2, dims[-1])
    assert jnp.allclose(out2, ref2, atol=5e-2, rtol=5e-2)

    print("KERNEL_OK")
</pallas_src>

<mosaic_0001>
module attributes {stable_mosaic.version = 11 : i64} {
  func.func @_fused_mlp_kernel(%arg0: i32, %arg1: memref<32x8xf32, #tpu.memory_space<vmem>>, %arg2: memref<64x32xf32, #tpu.memory_space<vmem>>, %arg3: memref<64x1xf32, #tpu.memory_space<vmem>>, %arg4: memref<48x64xf32, #tpu.memory_space<vmem>>, %arg5: memref<48x1xf32, #tpu.memory_space<vmem>>, %arg6: memref<16x48xf32, #tpu.memory_space<vmem>>, %arg7: memref<16x1xf32, #tpu.memory_space<vmem>>, %arg8: memref<16x8xf32, #tpu.memory_space<vmem>>) attributes {dimension_semantics = [#tpu.dimension_semantics<parallel>], iteration_bounds = array<i64: 1>, scalar_prefetch = 0 : i64, scratch_operands = 0 : i64, tpu.core_type = #tpu.core_type<tc>, window_params = [{transform_indices = @transform_0, window_bounds = array<i64: 32, 8>}, {pipeline_mode = #tpu.pipeline_mode<synchronous>, transform_indices = @transform_1, window_bounds = array<i64: 64, 32>}, {pipeline_mode = #tpu.pipeline_mode<synchronous>, transform_indices = @transform_2, window_bounds = array<i64: 64, 1>}, {pipeline_mode = #tpu.pipeline_mode<synchronous>, transform_indices = @transform_3, window_bounds = array<i64: 48, 64>}, {pipeline_mode = #tpu.pipeline_mode<synchronous>, transform_indices = @transform_4, window_bounds = array<i64: 48, 1>}, {pipeline_mode = #tpu.pipeline_mode<synchronous>, transform_indices = @transform_5, window_bounds = array<i64: 16, 48>}, {pipeline_mode = #tpu.pipeline_mode<synchronous>, transform_indices = @transform_6, window_bounds = array<i64: 16, 1>}, {transform_indices = @transform_7, window_bounds = array<i64: 16, 8>}]} {
    %c0 = arith.constant 0 : index
    %c0_0 = arith.constant 0 : index
    %0 = vector.load %arg1[%c0, %c0_0] : memref<32x8xf32, #tpu.memory_space<vmem>>, vector<32x8xf32>
    %c0_1 = arith.constant 0 : index
    %c0_2 = arith.constant 0 : index
    %1 = vector.load %arg2[%c0_1, %c0_2] : memref<64x32xf32, #tpu.memory_space<vmem>>, vector<64x32xf32>
    %c0_3 = arith.constant 0 : index
    %c0_4 = arith.constant 0 : index
    %2 = vector.load %arg3[%c0_3, %c0_4] : memref<64x1xf32, #tpu.memory_space<vmem>>, vector<64x1xf32>
    %cst = arith.constant dense<0.000000e+00> : vector<64x8xf32>
    %3 = tpu.matmul %1, %0, %cst {dimension_numbers = #tpu.dot_dimension_numbers<[1], [0], [0], [1], [0, 0, 1, 1], [], []>} : vector<64x32xf32>, vector<32x8xf32>, vector<64x8xf32> -> vector<64x8xf32>
    %4 = vector.broadcast %2 : vector<64x1xf32> to vector<64x8xf32>
    %5 = arith.addf %3, %4 : vector<64x8xf32>
    %cst_5 = arith.constant 0.000000e+00 : f32
    %6 = vector.broadcast %cst_5 : f32 to vector<64x8xf32>
    %7 = arith.maximumf %5, %6 : vector<64x8xf32>
    %c0_6 = arith.constant 0 : index
    %c0_7 = arith.constant 0 : index
    %8 = vector.load %arg4[%c0_6, %c0_7] : memref<48x64xf32, #tpu.memory_space<vmem>>, vector<48x64xf32>
    %c0_8 = arith.constant 0 : index
    %c0_9 = arith.constant 0 : index
    %9 = vector.load %arg5[%c0_8, %c0_9] : memref<48x1xf32, #tpu.memory_space<vmem>>, vector<48x1xf32>
    %cst_10 = arith.constant dense<0.000000e+00> : vector<48x8xf32>
    %10 = tpu.matmul %8, %7, %cst_10 {dimension_numbers = #tpu.dot_dimension_numbers<[1], [0], [0], [1], [0, 0, 1, 1], [], []>} : vector<48x64xf32>, vector<64x8xf32>, vector<48x8xf32> -> vector<48x8xf32>
    %11 = vector.broadcast %9 : vector<48x1xf32> to vector<48x8xf32>
    %12 = arith.addf %10, %11 : vector<48x8xf32>
    %cst_11 = arith.constant 0.000000e+00 : f32
    %13 = vector.broadcast %cst_11 : f32 to vector<48x8xf32>
    %14 = arith.maximumf %12, %13 : vector<48x8xf32>
    %c0_12 = arith.constant 0 : index
    %c0_13 = arith.constant 0 : index
    %15 = vector.load %arg6[%c0_12, %c0_13] : memref<16x48xf32, #tpu.memory_space<vmem>>, vector<16x48xf32>
    %c0_14 = arith.constant 0 : index
    %c0_15 = arith.constant 0 : index
    %16 = vector.load %arg7[%c0_14, %c0_15] : memref<16x1xf32, #tpu.memory_space<vmem>>, vector<16x1xf32>
    %cst_16 = arith.constant dense<0.000000e+00> : vector<16x8xf32>
    %17 = tpu.matmul %15, %14, %cst_16 {dimension_numbers = #tpu.dot_dimension_numbers<[1], [0], [0], [1], [0, 0, 1, 1], [], []>} : vector<16x48xf32>, vector<48x8xf32>, vector<16x8xf32> -> vector<16x8xf32>
    %18 = vector.broadcast %16 : vector<16x1xf32> to vector<16x8xf32>
    %19 = arith.addf %17, %18 : vector<16x8xf32>
    %c0_17 = arith.constant 0 : index
    %c0_18 = arith.constant 0 : index
    %20 = vector.load %arg8[%c0_17, %c0_18] : memref<16x8xf32, #tpu.memory_space<vmem>>, vector<16x8xf32>
    tpu.vector_store %arg8[%c0_17, %c0_18], %19 {strides = array<i32>} : memref<16x8xf32, #tpu.memory_space<vmem>>, vector<16x8xf32>,
    return
  }
  func.func @transform_0(%arg0: i32) -> (i32, i32) {
    %c0_i32 = arith.constant 0 : i32
    %c0_i32_0 = arith.constant 0 : i32
    return %c0_i32, %arg0 : i32, i32
  }
  func.func @transform_1(%arg0: i32) -> (i32, i32) {
    %c0_i32 = arith.constant 0 : i32
    %c0_i32_0 = arith.constant 0 : i32
    %c0_i32_1 = arith.constant 0 : i32
    return %c0_i32, %c0_i32_0 : i32, i32
  }
  func.func @transform_2(%arg0: i32) -> (i32, i32) {
    %c0_i32 = arith.constant 0 : i32
    %c0_i32_0 = arith.constant 0 : i32
    %c0_i32_1 = arith.constant 0 : i32
    return %c0_i32, %c0_i32_0 : i32, i32
  }
  func.func @transform_3(%arg0: i32) -> (i32, i32) {
    %c0_i32 = arith.constant 0 : i32
    %c0_i32_0 = arith.constant 0 : i32
    %c0_i32_1 = arith.constant 0 : i32
    return %c0_i32, %c0_i32_0 : i32, i32
  }
  func.func @transform_4(%arg0: i32) -> (i32, i32) {
    %c0_i32 = arith.constant 0 : i32
    %c0_i32_0 = arith.constant 0 : i32
    %c0_i32_1 = arith.constant 0 : i32
    return %c0_i32, %c0_i32_0 : i32, i32
  }
  func.func @transform_5(%arg0: i32) -> (i32, i32) {
    %c0_i32 = arith.constant 0 : i32
    %c0_i32_0 = arith.constant 0 : i32
    %c0_i32_1 = arith.constant 0 : i32
    return %c0_i32, %c0_i32_0 : i32, i32
  }
  func.func @transform_6(%arg0: i32) -> (i32, i32) {
    %c0_i32 = arith.constant 0 : i32
    %c0_i32_0 = arith.constant 0 : i32
    %c0_i32_1 = arith.constant 0 : i32
    return %c0_i32, %c0_i32_0 : i32, i32
  }
  func.func @transform_7(%arg0: i32) -> (i32, i32) {
    %c0_i32 = arith.constant 0 : i32
    %c0_i32_0 = arith.constant 0 : i32
    return %c0_i32, %arg0 : i32, i32
  }
}

</mosaic_0001>

<bundles_post_ra>
// kernel: tpu_custom_call.1
= control target key start
LH: loop header
LB: loop body
LE: loop exit
PB: predicated region body
PF: predicated region fallthrough
CT: control target
= control target key end

     0   :  { %vm86_vm0 = vcmask 261120   ;;  %v638_v3 = vmov 0   ;;  %vm266_vm1 = vcmask 523264   ;;  %vm400_vm2 = vcmask 392192   ;;  %s809_s0 = inlined_call_operand.vmem [shape: f32[32,8], index: 0, kind: input, shape index: {}]   ;;  %s810_s1 = inlined_call_operand.vmem [shape: f32[64,32], index: 1, kind: input, shape index: {}]   ;;  %s811_s2 = inlined_call_operand.vmem [shape: f32[64,1], index: 2, kind: input, shape index: {}]   ;;  %s812_s4 = inlined_call_operand.vmem [shape: f32[48,1], index: 4, kind: input, shape index: {}]   ;;  %s813_s6 = inlined_call_operand.vmem [shape: f32[16,1], index: 6, kind: input, shape index: {}]   ;;  %s814_s3 = inlined_call_operand.vmem [shape: f32[48,64], index: 3, kind: input, shape index: {}]   ;;  %s815_s5 = inlined_call_operand.vmem [shape: f32[16,48], index: 5, kind: input, shape index: {}]   ;;  %s816_s7 = inlined_call_operand.vmem [shape: f32[16,8], index: 7, kind: output, shape index: {}]  }
   0x1   :  { %v26_v0 = vld [vmem:[%s809_s0] sm:$0xff]  ;;  %v27_v1 = vld [vmem:[%s809_s0 + $0x8] sm:$0xff]  ;;  %v28_v2 = vld [vmem:[%s809_s0 + $0x10] sm:$0xff]  ;;  %636 = vset.pattern.permute.xlu0 %v638_v3  ;;  %637 = vset.pattern.permute.xlu1 %v638_v3  ;;  %vm482_vm3 = vcmask 64512  }
   0x2   :  { %v599_v4 = vpack.c.bf16 %v27_v1, %v26_v0  ;;  %v29_v5 = vld [vmem:[%s809_s0 + $0x18] sm:$0xff]  ;;  %v30_v6 = vld [vmem:[%s810_s1] sm:$0xff]  ;;  %v40_v9 = vld [vmem:[%s811_s2 + $0x10] sm:$0xff] }
   0x3   :  { %v603_v7 = vpack.c.bf16 %v29_v5, %v28_v2  ;;  %547 = vmatprep.mubr.msk.f32.mxu0 %vm86_vm0, %v30_v6  ;;  %v38_v8 = vld [vmem:[%s811_s2] sm:$0xff]  ;;  %58 = vperm.xlu1 %637, %v40_v9   ;;  %v39_v10 = vld [vmem:[%s811_s2 + $0x8] sm:$0xff]  ;;  %v41_v11 = vld [vmem:[%s811_s2 + $0x18] sm:$0xff] }
   0x4   :  { %600 = vmatprep.subr.bf16.mxu0 %v599_v4  ;;  %48 = vperm.xlu0 %636, %v38_v8   ;;  %v31_v12 = vld [vmem:[%s810_s1 + $0x8] sm:$0xff]  ;;  %v32_v13 = vld [vmem:[%s810_s1 + $0x10] sm:$0xff]  ;;  %v42_v14 = vld [vmem:[%s811_s2 + $0x20] sm:$0xff] }
   0x5   :  { %602 = vmatpush3.bf16.msra.mxu0 %v599_v4  ;;  %v43_v15 = vld [vmem:[%s811_s2 + $0x28] sm:$0xff]  ;;  %v33_v16 = vld [vmem:[%s810_s1 + $0x18] sm:$0xff]  ;;  %v34_v17 = vld [vmem:[%s810_s1 + $0x20] sm:$0xff] }
   0x6   :  { %604 = vmatprep.subr.bf16.mxu0 %v603_v7  ;;  %v44_v18 = vld [vmem:[%s811_s2 + $0x30] sm:$0xff]  ;;  %v45_v19 = vld [vmem:[%s811_s2 + $0x38] sm:$0xff]  ;;  %v35_v20 = vld [vmem:[%s810_s1 + $0x28] sm:$0xff] }
   0x7   :  { %63 = vperm.xlu1 %637, %v41_v11   ;;  %v36_v21 = vld [vmem:[%s810_s1 + $0x30] sm:$0xff]  ;;  %v230_v22 = vld [vmem:[%s812_s4] sm:$0xff]  ;;  %v231_v23 = vld [vmem:[%s812_s4 + $0x8] sm:$0xff] }
   0x8   :  { %53 = vperm.xlu0 %636, %v39_v10   ;;  %v37_v24 = vld [vmem:[%s810_s1 + $0x38] sm:$0xff]  ;;  %v232_v25 = vld [vmem:[%s812_s4 + $0x10] sm:$0xff]  ;;  %v234_v27 = vld [vmem:[%s812_s4 + $0x20] sm:$0xff] }
   0x9   :  { %606 = vmatpush3.bf16.msra.mxu0 %v603_v7  ;;  %v233_v26 = vld [vmem:[%s812_s4 + $0x18] sm:$0xff]  ;;  %v235_v28 = vld [vmem:[%s812_s4 + $0x28] sm:$0xff]  ;;  %v388_v29 = vld [vmem:[%s813_s6] sm:$0xff] }
   0xa   :  { %v389_v30 = vld [vmem:[%s813_s6 + $0x8] sm:$0xff]  ;;  %v224_v31 = vld [vmem:[%s814_s3] sm:$0xff]  ;;  %v226_v5 = vld [vmem:[%s814_s3 + $0x10] sm:$0xff] }
   0xb   :  { %73 = vperm.xlu1 %637, %v43_v15   ;;  %575 = vmatprep.mubr.msk.f32.mxu1 %vm266_vm1, %v224_v31  ;;  %v225_v4 = vld [vmem:[%s814_s3 + $0x8] sm:$0xff]  ;;  %v227_v6 = vld [vmem:[%s814_s3 + $0x18] sm:$0xff]  ;;  %v228_v7 = vld [vmem:[%s814_s3 + $0x20] sm:$0xff] }
   0xc   :  { %548 = vmatmul.mubr.msk.f32.vlgmr.msra.gmra.mrb[0].mxu0 %vm86_vm0, %v31_v12  ;;  %68 = vperm.xlu0 %636, %v42_v14   ;;  %v229_v8 = vld [vmem:[%s814_s3 + $0x28] sm:$0xff]  ;;  %v386_v9 = vld [vmem:[%s815_s5] sm:$0xff] }
   0xd   :  { %550 = vmatprep.mubr.msk.f32.mxu0 %vm86_vm0, %v32_v13 }
   0xf   :  { %83 = vperm.xlu1 %637, %v45_v19  }
  0x10   :  { %551 = vmatmul.mubr.msk.f32.gmra.mrb[2].mxu0 %vm86_vm0, %v33_v16  ;;  %78 = vperm.xlu0 %636, %v44_v18  }
  0x11   :  { %553 = vmatprep.mubr.msk.f32.mxu0 %vm86_vm0, %v34_v17 }
  0x13   :  { %243 = vperm.xlu1 %637, %v231_v23  }
  0x14   :  { %554 = vmatmul.mubr.msk.f32.gmra.mrb[4].mxu0 %vm86_vm0, %v35_v20  ;;  %238 = vperm.xlu0 %636, %v230_v22  }
  0x15   :  { %556 = vmatprep.mubr.msk.f32.mxu0 %vm86_vm0, %v36_v21 }
  0x17   :  { %253 = vperm.xlu1 %637, %v233_v26  }
  0x18   :  { %557 = vmatmul.mubr.msk.f32.gmra.mrb[6].mxu0 %vm86_vm0, %v37_v24  ;;  %248 = vperm.xlu0 %636, %v232_v25  }
  0x19   :  { %596 = vmatprep.mubr.msk.f32.mxu0 %vm400_vm2, %v386_v9 }
  0x1b   :  { %263 = vperm.xlu1 %637, %v235_v28  }
  0x1c   :  { %258 = vperm.xlu0 %636, %v234_v27  }
  0x1f   :  { %397 = vperm.xlu1 %637, %v389_v30  }
  0x20   :  { %392 = vperm.xlu0 %636, %v388_v29  }
  0x82   :  { %v59_v33 = vpop.permute.xlu1 %58 }
  0x83   :  { %v49_v32 = vpop.permute.xlu0 %48 }
  0x86   :  { %v64_v35 = vpop.permute.xlu1 %63 }
  0x87   :  { %v54_v34 = vpop.permute.xlu0 %53 }
  0x8a   :  { %v74_v45 = vpop.permute.xlu1 %73 }
  0x8b   :  { %v69_v48 = vpop.permute.xlu0 %68 }
  0x8e   :  { %v84_v57 = vpop.permute.xlu1 %83 }
  0x8f   :  { %v79_v60 = vpop.permute.xlu0 %78 }
  0x92   :  { %v244_v10 = vpop.permute.xlu1 %243 }
  0x93   :  { %v239_v11 = vpop.permute.xlu0 %238 }
  0x96   :  { %v254_v15 = vpop.permute.xlu1 %253 }
  0x97   :  { %v249_v17 = vpop.permute.xlu0 %248 }
  0x9a   :  { %v264_v26 = vpop.permute.xlu1 %263 }
  0x9b   :  { %v259_v29 = vpop.permute.xlu0 %258 }
  0xdf   :  { %v549_v36 = vpop.f32.mrb[0].mxu0 }
  0xe0   :  { %v183_v37 = vadd.f32 %v549_v36, %v54_v34  ;;  %v177_v38 = vpop.f32.mrb[1].mxu0 }
  0xe1   :  { %v178_v39 = vadd.f32 %v177_v38, %v49_v32  ;;  %v398_v38 = vpop.permute.xlu1 %397 }
  0xe2   :  { %v217_v40 = vmax.f32 %v183_v37, 0.0  ;;  %v387_v37 = vld [vmem:[%s815_s5 + $0x8] sm:$0xff] }
  0xe3   :  { %v216_v41 = vmax.f32 %v178_v39, 0.0  ;;  %v552_v42 = vpop.f32.mrb[2].mxu0 }
  0xe4   :  { %v193_v43 = vadd.f32 %v552_v42, %v64_v35  ;;  %v187_v44 = vpop.f32.mrb[3].mxu0 }
  0xe5   :  { %v188_v46 = vadd.f32 %v187_v44, %v59_v33  ;;  %v607_v47 = vpack.c.bf16 %v217_v40, %v216_v41  ;;  %v393_v40 = vpop.permute.xlu0 %392 }
  0xe6   :  { %v219_v49 = vmax.f32 %v193_v43, 0.0 }
  0xe7   :  { %v218_v50 = vmax.f32 %v188_v46, 0.0  ;;  %v555_v51 = vpop.f32.mrb[4].mxu0  ;;  %608 = vmatprep.subr.bf16.mxu1 %v607_v47 }
  0xe8   :  { %v203_v52 = vadd.f32 %v555_v51, %v74_v45  ;;  %v197_v53 = vpop.f32.mrb[5].mxu0  ;;  %610 = vmatpush3.bf16.msra.mxu1 %v607_v47 }
  0xe9   :  { %v611_v54 = vpack.c.bf16 %v219_v49, %v218_v50  ;;  %v198_v55 = vadd.f32 %v197_v53, %v69_v48 }
  0xea   :  { %v221_v56 = vmax.f32 %v203_v52, 0.0 }
  0xeb   :  { %v220_v58 = vmax.f32 %v198_v55, 0.0  ;;  %v558_v59 = vpop.f32.mrb[6].mxu0  ;;  %612 = vmatprep.subr.bf16.mxu1 %v611_v54 }
  0xec   :  { %v213_v61 = vadd.f32 %v558_v59, %v84_v57  ;;  %v207_v62 = vpop.f32.mrb[7].mxu0  ;;  %614 = vmatpush3.bf16.msra.mxu1 %v611_v54 }
  0xed   :  { %v615_v63 = vpack.c.bf16 %v221_v56, %v220_v58  ;;  %v208_v0 = vadd.f32 %v207_v62, %v79_v60 }
  0xee   :  { %v223_v1 = vmax.f32 %v213_v61, 0.0 }
  0xef   :  { %v222_v2 = vmax.f32 %v208_v0, 0.0  ;;  %616 = vmatprep.subr.bf16.mxu1 %v615_v63 }
  0xf0   :  { %618 = vmatpush3.bf16.msra.mxu1 %v615_v63 }
  0xf1   :  { %v619_v3 = vpack.c.bf16 %v223_v1, %v222_v2 }
  0xf3   :  { %620 = vmatprep.subr.bf16.mxu1 %v619_v3 }
  0xf4   :  { %622 = vmatpush3.bf16.msra.mxu1 %v619_v3 }
  0xf7   :  { %576 = vmatmul.mubr.msk.f32.vlgmr.msra.gmra.mrb[0].mxu1 %vm266_vm1, %v225_v4 }
  0xf8   :  { %578 = vmatprep.mubr.msk.f32.mxu1 %vm266_vm1, %v226_v5 }
  0xfb   :  { %579 = vmatmul.mubr.msk.f32.gmra.mrb[2].mxu1 %vm266_vm1, %v227_v6 }
  0xfc   :  { %581 = vmatprep.mubr.msk.f32.mxu1 %vm266_vm1, %v228_v7 }
  0xff   :  { %582 = vmatmul.mubr.msk.f32.gmra.mrb[4].mxu1 %vm266_vm1, %v229_v8 }
 0x1ca   :  { %v577_v12 = vpop.f32.mrb[0].mxu1 }
 0x1cb   :  { %v357_v13 = vadd.f32 %v577_v12, %v244_v10  ;;  %v351_v14 = vpop.f32.mrb[1].mxu1 }
 0x1cc   :  { %v352_v16 = vadd.f32 %v351_v14, %v239_v11 }
 0x1cd   :  { %v381_v18 = vmax.f32 %v357_v13, 0.0 }
 0x1ce   :  { %v380_v19 = vmax.f32 %v352_v16, 0.0  ;;  %v580_v20 = vpop.f32.mrb[2].mxu1 }
 0x1cf   :  { %v367_v21 = vadd.f32 %v580_v20, %v254_v15  ;;  %v361_v22 = vpop.f32.mrb[3].mxu1 }
 0x1d0   :  { %v623_v23 = vpack.c.bf16 %v381_v18, %v380_v19  ;;  %v362_v24 = vadd.f32 %v361_v22, %v249_v17 }
 0x1d1   :  { %v383_v25 = vmax.f32 %v367_v21, 0.0 }
 0x1d2   :  { %v382_v27 = vmax.f32 %v362_v24, 0.0  ;;  %v583_v28 = vpop.f32.mrb[4].mxu1  ;;  %624 = vmatprep.subr.bf16.mxu0 %v623_v23 }
 0x1d3   :  { %v377_v30 = vadd.f32 %v583_v28, %v264_v26  ;;  %v371_v31 = vpop.f32.mrb[5].mxu1  ;;  %626 = vmatpush3.bf16.msra.mxu0 %v623_v23 }
 0x1d4   :  { %v627_v32 = vpack.c.bf16 %v383_v25, %v382_v27  ;;  %v372_v33 = vadd.f32 %v371_v31, %v259_v29 }
 0x1d5   :  { %v385_v34 = vmax.f32 %v377_v30, 0.0 }
 0x1d6   :  { %v384_v35 = vmax.f32 %v372_v33, 0.0  ;;  %628 = vmatprep.subr.bf16.mxu0 %v627_v32 }
 0x1d7   :  { %630 = vmatpush3.bf16.msra.mxu0 %v627_v32 }
 0x1d8   :  { %v631_v36 = vpack.c.bf16 %v385_v34, %v384_v35 }
 0x1da   :  { %632 = vmatprep.subr.bf16.mxu0 %v631_v36 }
 0x1db   :  { %634 = vmatpush3.bf16.msra.mxu0 %v631_v36 }
 0x1de   :  { %597 = vmatmul.mubr.msk.f32.vlgmr.msra.gmra.mrb[8].mxu0 %vm400_vm2, %v387_v37 }
 0x2b1   :  { %v598_v39 = vpop.f32.mrb[8].mxu0 }
 0x2b2   :  { %v479_v41 = vadd.f32 %v598_v39, %v398_v38  ;;  %v473_v42 = vpop.f32.mrb[9].mxu0 }
 0x2b3   :  { %v474_v43 = vadd.f32 %v473_v42, %v393_v40 }
 0x2b4   :  { %484 = vst.msk [vmem:[%s816_s7 + $0x8] sm:$0xff] %vm482_vm3, %v479_v41 }
 0x2b5   :  { %483 = vst.msk [vmem:[%s816_s7] sm:$0xff] %vm482_vm3, %v474_v43 }

</bundles_post_ra>
